<compile_context>
chip_gen: v7x
topology: tpu7x:2x2x1
jax: 0.10.0
libtpu: 0.0.40
codegen_flags: <defaults>
</compile_context>

<pallas_src>
import functools

import jax
import jax.numpy as jnp
from jax import lax
from jax.experimental import pallas as pl
from jax.experimental.pallas import tpu as pltpu


# ------------- Fused kernel: 3x3 conv + GroupNorm + scale/shift + SiLU -------
def _fused_kernel(x_ref, w_ref, m_ref, a_ref, b_ref, out_ref, *,
                  width, hw, eps, inv_count):
    # x_ref:  (1, Cin, HW)     input slab for batch n (lane-dense HW)
    # w_ref:  (1, 9, Cg, Cin)  per-tap weights for group g
    # m_ref:  (9, 1, HW)       0/1 validity mask per tap (conv "same" padding)
    # a_ref:  (1, 1, Cg, 1)    folded coeff  gamma*(1+scale)           (f32)
    # b_ref:  (1, 1, Cg, 1)    folded coeff  beta*(1+scale)+shift      (f32)
    # out_ref:(1, 1, Cg, HW)
    x = x_ref[0].astype(jnp.float32)                      # (Cin, HW)
    cg = out_ref.shape[2]

    # 3x3 conv as 9 accumulated MXU matmuls; taps built in-kernel via lane roll.
    acc = jnp.zeros((cg, hw), dtype=jnp.float32)
    t = 0
    for dy in range(3):
        for dx in range(3):
            off = (dy - 1) * width + (dx - 1)
            if off == 0:
                xs = x                                    # center tap, no shift
            else:
                xs = pltpu.roll(x, (-off) % hw, 1)        # xs[p] = x[(p+off) % HW]
                xs = xs * m_ref[t]                        # zero out-of-bounds taps
            acc = acc + jnp.dot(w_ref[0, t].astype(jnp.float32), xs,
                                preferred_element_type=jnp.float32)
            t += 1

    # GroupNorm statistics (single pass) over this (batch, group) tile.
    s1 = jnp.sum(acc, axis=(0, 1), keepdims=True)
    s2 = jnp.sum(acc * acc, axis=(0, 1), keepdims=True)
    mean = s1 * inv_count
    var = jnp.maximum(s2 * inv_count - mean * mean, 0.0)
    inv = lax.rsqrt(var + eps)

    # GN affine + (1+scale)/shift modulation, pre-folded into a, b.
    a = a_ref[0, 0]                                       # (Cg, 1) f32
    b = b_ref[0, 0]
    y = (acc - mean) * (inv * a) + b
    out_ref[...] = (y * jax.nn.sigmoid(y))[None, None].astype(out_ref.dtype)


def _vmem_limit_bytes(cin, cg, hw, itemsize):
    # double-buffered IO blocks + f32 compute temps + headroom; capped so the
    # request stays safe on v7x's 64 MiB physical VMEM.
    io = (cin * hw + cg * hw) * itemsize + 9 * hw * 4 + 9 * cg * cin * 4 + 2 * cg * 4
    f32_tmp = (cin * hw + 3 * cg * hw) * 4
    need = 2 * io + f32_tmp + (8 << 20)
    return int(min(max(need, 16 << 20), 48 << 20))


def feature_projection(x, emb, conv_w, gamma, beta, proj_w, proj_b, *,
                       groups, eps=1e-5):
    """Forward of FeatureProjection (scale_shift=True when emb is not None).

    x:      (N, Cin, H, W)    NCHW, like PyTorch
    emb:    (N, emb_dim) or None (None -> plain GroupNorm, no modulation)
    conv_w: (Cout, Cin, 3, 3) Conv2d weight (bias-free)
    gamma, beta: (Cout,)      GroupNorm affine params
    proj_w: (emb_dim, 2*Cout) Linear weight (pre-transposed vs. PyTorch)
    proj_b: (2*Cout,)         Linear bias
    """
    N, Cin, H, W = x.shape
    Cout = conv_w.shape[0]
    G = groups
    Cg = Cout // G
    HW = H * W

    # Lane-dense input slab.
    x3 = x.reshape(N, Cin, HW)

    # Per-tap, per-group weight matrices: (G, 9, Cg, Cin).
    w_taps = jnp.transpose(conv_w, (2, 3, 0, 1)).reshape(9, Cout, Cin)
    w_g = w_taps.reshape(9, G, Cg, Cin).transpose(1, 0, 2, 3)

    # 0/1 validity masks per tap (same-padding), tiny: (9, 1, HW) f32.
    p = jnp.arange(HW, dtype=jnp.int32)
    hh = p // W
    ww = p % W
    masks = []
    for dy in range(3):
        for dx in range(3):
            h2 = hh + (dy - 1)
            w2 = ww + (dx - 1)
            masks.append((h2 >= 0) & (h2 < H) & (w2 >= 0) & (w2 < W))
    masks = jnp.stack(masks, axis=0).astype(jnp.float32).reshape(9, 1, HW)

    # Tiny embedding projection + coefficient folding in plain jnp (f32).
    gamma32 = gamma.astype(jnp.float32)[None, :]
    beta32 = beta.astype(jnp.float32)[None, :]
    if emb is None:
        a = jnp.broadcast_to(gamma32, (N, Cout))
        b = jnp.broadcast_to(beta32, (N, Cout))
    else:
        e = emb.astype(jnp.float32)
        e = e * jax.nn.sigmoid(e)                                   # SiLU
        proj = e @ proj_w.astype(jnp.float32) + proj_b.astype(jnp.float32)
        scale, shift = proj[:, :Cout], proj[:, Cout:]
        a = gamma32 * (1.0 + scale)                                 # out = xn*a + b
        b = beta32 * (1.0 + scale) + shift
    a4 = a.reshape(N, G, Cg, 1)                                     # float32
    b4 = b.reshape(N, G, Cg, 1)

    kernel = functools.partial(_fused_kernel, width=W, hw=HW, eps=eps,
                               inv_count=1.0 / (Cg * HW))
    out = pl.pallas_call(
        kernel,
        out_shape=jax.ShapeDtypeStruct((N, G, Cg, HW), x.dtype),
        grid=(N, G),
        in_specs=[
            pl.BlockSpec((1, Cin, HW), lambda n, g: (n, 0, 0)),
            pl.BlockSpec((1, 9, Cg, Cin), lambda n, g: (g, 0, 0, 0)),
            pl.BlockSpec((9, 1, HW), lambda n, g: (0, 0, 0)),
            pl.BlockSpec((1, 1, Cg, 1), lambda n, g: (n, g, 0, 0)),
            pl.BlockSpec((1, 1, Cg, 1), lambda n, g: (n, g, 0, 0)),
        ],
        out_specs=pl.BlockSpec((1, 1, Cg, HW), lambda n, g: (n, g, 0, 0)),
        compiler_params=pltpu.CompilerParams(
            dimension_semantics=("parallel", "parallel"),
            vmem_limit_bytes=_vmem_limit_bytes(
                Cin, Cg, HW, jnp.dtype(x.dtype).itemsize)),
    )(x3, w_g, masks, a4, b4)
    return out.reshape(N, Cout, H, W)


# ------------------------------ reference -----------------------------------
def _reference(x, emb, conv_w, gamma, beta, proj_w, proj_b, *, groups, eps=1e-5):
    N, Cin, H, W = x.shape
    Cout = conv_w.shape[0]
    G = groups
    y = lax.conv_general_dilated(
        x, conv_w, window_strides=(1, 1), padding=((1, 1), (1, 1)),
        dimension_numbers=("NCHW", "OIHW", "NCHW"),
        precision=lax.Precision.HIGHEST)
    e = emb * jax.nn.sigmoid(emb)
    proj = e @ proj_w + proj_b
    scale = proj[:, :Cout][:, :, None, None]
    shift = proj[:, Cout:][:, :, None, None]
    yg = y.reshape(N, G, Cout // G, H, W)
    mean = yg.mean(axis=(2, 3, 4), keepdims=True)
    var = ((yg - mean) ** 2).mean(axis=(2, 3, 4), keepdims=True)
    yn = ((yg - mean) / jnp.sqrt(var + eps)).reshape(N, Cout, H, W)
    yn = yn * gamma[None, :, None, None] + beta[None, :, None, None]
    out = yn * (1.0 + scale) + shift
    return out * jax.nn.sigmoid(out)


if __name__ == "__main__":
    # Small shapes consistent with FeatureProjection(dim=4, dim_out=8, groups=2,
    # scale_shift=True, emb_dim=32).
    N, Cin, H, W = 2, 4, 16, 16
    Cout, groups, emb_dim = 8, 2, 32

    key = jax.random.PRNGKey(0)
    kx, ke, kc, kw, kb = jax.random.split(key, 5)

    x = jax.random.normal(kx, (N, Cin, H, W), dtype=jnp.float32)
    emb = jax.random.normal(ke, (N, emb_dim), dtype=jnp.float32)

    conv_w = 0.1 * jax.random.normal(kc, (Cout, Cin, 3, 3), dtype=jnp.float32)
    gamma = jnp.ones((Cout,), dtype=jnp.float32)       # GroupNorm defaults
    beta = jnp.zeros((Cout,), dtype=jnp.float32)
    proj_w = 0.1 * jax.random.normal(kw, (emb_dim, 2 * Cout), dtype=jnp.float32)
    proj_b = 0.1 * jax.random.normal(kb, (2 * Cout,), dtype=jnp.float32)

    out = feature_projection(x, emb, conv_w, gamma, beta, proj_w, proj_b,
                             groups=groups, eps=1e-5)
    out = jax.block_until_ready(out)

    ref = _reference(x, emb, conv_w, gamma, beta, proj_w, proj_b,
                     groups=groups, eps=1e-5)
    assert out.shape == (N, Cout, H, W)
    assert jnp.allclose(out, ref, atol=1e-3, rtol=1e-3), "mismatch vs reference"

    print("KERNEL_OK")
</pallas_src>

<mosaic_0001>
module attributes {stable_mosaic.version = 11 : i64} {
  func.func @_fused_kernel(%arg0: i32, %arg1: i32, %arg2: memref<1x4x256xf32, #tpu.memory_space<vmem>>, %arg3: memref<1x9x4x4xf32, #tpu.memory_space<vmem>>, %arg4: memref<9x1x256xf32, #tpu.memory_space<vmem>>, %arg5: memref<1x1x4x1xf32, #tpu.memory_space<vmem>>, %arg6: memref<1x1x4x1xf32, #tpu.memory_space<vmem>>, %arg7: memref<1x1x4x256xf32, #tpu.memory_space<vmem>>) attributes {dimension_semantics = [#tpu.dimension_semantics<parallel>, #tpu.dimension_semantics<parallel>], iteration_bounds = array<i64: 2, 2>, scalar_prefetch = 0 : i64, scratch_operands = 0 : i64, tpu.core_type = #tpu.core_type<tc>, window_params = [{transform_indices = @transform_0, window_bounds = array<i64: 1, 4, 256>}, {transform_indices = @transform_1, window_bounds = array<i64: 1, 9, 4, 4>}, {pipeline_mode = #tpu.pipeline_mode<synchronous>, transform_indices = @transform_2, window_bounds = array<i64: 9, 1, 256>}, {transform_indices = @transform_3, window_bounds = array<i64: 1, 1, 4, 1>}, {transform_indices = @transform_4, window_bounds = array<i64: 1, 1, 4, 1>}, {transform_indices = @transform_5, window_bounds = array<i64: 1, 1, 4, 256>}]} {
    %c0 = arith.constant 0 : index
    %c0_0 = arith.constant 0 : index
    %c0_1 = arith.constant 0 : index
    %0 = vector.load %arg2[%c0, %c0_0, %c0_1] : memref<1x4x256xf32, #tpu.memory_space<vmem>>, vector<1x4x256xf32>
    %1 = vector.shape_cast %0 : vector<1x4x256xf32> to vector<4x256xf32>
    %cst = arith.constant 0.000000e+00 : f32
    %2 = vector.broadcast %cst : f32 to vector<4x256xf32>
    %c17_i32 = arith.constant 17 : i32
    %3 = tpu.dynamic_rotate %1 by %c17_i32 dim 1 : vector<4x256xf32>, i32 -> vector<4x256xf32>
    %c0_2 = arith.constant 0 : index
    %c0_3 = arith.constant 0 : index
    %c0_4 = arith.constant 0 : index
    %4 = vector.load %arg4[%c0_2, %c0_3, %c0_4] : memref<9x1x256xf32, #tpu.memory_space<vmem>>, vector<1x1x256xf32>
    %5 = vector.shape_cast %4 : vector<1x1x256xf32> to vector<1x256xf32>
    %6 = vector.broadcast %5 : vector<1x256xf32> to vector<4x256xf32>
    %7 = arith.mulf %3, %6 : vector<4x256xf32>
    %c0_5 = arith.constant 0 : index
    %c0_6 = arith.constant 0 : index
    %c0_7 = arith.constant 0 : index
    %c0_8 = arith.constant 0 : index
    %8 = vector.load %arg3[%c0_5, %c0_6, %c0_7, %c0_8] : memref<1x9x4x4xf32, #tpu.memory_space<vmem>>, vector<1x1x4x4xf32>
    %9 = vector.shape_cast %8 : vector<1x1x4x4xf32> to vector<4x4xf32>
    %cst_9 = arith.constant dense<0.000000e+00> : vector<4x256xf32>
    %10 = tpu.matmul %9, %7, %cst_9 {dimension_numbers = #tpu.dot_dimension_numbers<[1], [0], [0], [1], [0, 0, 1, 1], [], []>} : vector<4x4xf32>, vector<4x256xf32>, vector<4x256xf32> -> vector<4x256xf32>
    %11 = arith.addf %2, %10 : vector<4x256xf32>
    %c16_i32 = arith.constant 16 : i32
    %12 = tpu.dynamic_rotate %1 by %c16_i32 dim 1 : vector<4x256xf32>, i32 -> vector<4x256xf32>
    %c1 = arith.constant 1 : index
    %c0_10 = arith.constant 0 : index
    %c0_11 = arith.constant 0 : index
    %13 = vector.load %arg4[%c1, %c0_10, %c0_11] : memref<9x1x256xf32, #tpu.memory_space<vmem>>, vector<1x1x256xf32>
    %14 = vector.shape_cast %13 : vector<1x1x256xf32> to vector<1x256xf32>
    %15 = vector.broadcast %14 : vector<1x256xf32> to vector<4x256xf32>
    %16 = arith.mulf %12, %15 : vector<4x256xf32>
    %c0_12 = arith.constant 0 : index
    %c1_13 = arith.constant 1 : index
    %c0_14 = arith.constant 0 : index
    %c0_15 = arith.constant 0 : index
    %17 = vector.load %arg3[%c0_12, %c1_13, %c0_14, %c0_15] : memref<1x9x4x4xf32, #tpu.memory_space<vmem>>, vector<1x1x4x4xf32>
    %18 = vector.shape_cast %17 : vector<1x1x4x4xf32> to vector<4x4xf32>
    %cst_16 = arith.constant dense<0.000000e+00> : vector<4x256xf32>
    %19 = tpu.matmul %18, %16, %cst_16 {dimension_numbers = #tpu.dot_dimension_numbers<[1], [0], [0], [1], [0, 0, 1, 1], [], []>} : vector<4x4xf32>, vector<4x256xf32>, vector<4x256xf32> -> vector<4x256xf32>
    %20 = arith.addf %11, %19 : vector<4x256xf32>
    %c15_i32 = arith.constant 15 : i32
    %21 = tpu.dynamic_rotate %1 by %c15_i32 dim 1 : vector<4x256xf32>, i32 -> vector<4x256xf32>
    %c2 = arith.constant 2 : index
    %c0_17 = arith.constant 0 : index
    %c0_18 = arith.constant 0 : index
    %22 = vector.load %arg4[%c2, %c0_17, %c0_18] : memref<9x1x256xf32, #tpu.memory_space<vmem>>, vector<1x1x256xf32>
    %23 = vector.shape_cast %22 : vector<1x1x256xf32> to vector<1x256xf32>
    %24 = vector.broadcast %23 : vector<1x256xf32> to vector<4x256xf32>
    %25 = arith.mulf %21, %24 : vector<4x256xf32>
    %c0_19 = arith.constant 0 : index
    %c2_20 = arith.constant 2 : index
    %c0_21 = arith.constant 0 : index
    %c0_22 = arith.constant 0 : index
    %26 = vector.load %arg3[%c0_19, %c2_20, %c0_21, %c0_22] : memref<1x9x4x4xf32, #tpu.memory_space<vmem>>, vector<1x1x4x4xf32>
    %27 = vector.shape_cast %26 : vector<1x1x4x4xf32> to vector<4x4xf32>
    %cst_23 = arith.constant dense<0.000000e+00> : vector<4x256xf32>
    %28 = tpu.matmul %27, %25, %cst_23 {dimension_numbers = #tpu.dot_dimension_numbers<[1], [0], [0], [1], [0, 0, 1, 1], [], []>} : vector<4x4xf32>, vector<4x256xf32>, vector<4x256xf32> -> vector<4x256xf32>
    %29 = arith.addf %20, %28 : vector<4x256xf32>
    %c1_i32 = arith.constant 1 : i32
    %30 = tpu.dynamic_rotate %1 by %c1_i32 dim 1 : vector<4x256xf32>, i32 -> vector<4x256xf32>
    %c3 = arith.constant 3 : index
    %c0_24 = arith.constant 0 : index
    %c0_25 = arith.constant 0 : index
    %31 = vector.load %arg4[%c3, %c0_24, %c0_25] : memref<9x1x256xf32, #tpu.memory_space<vmem>>, vector<1x1x256xf32>
    %32 = vector.shape_cast %31 : vector<1x1x256xf32> to vector<1x256xf32>
    %33 = vector.broadcast %32 : vector<1x256xf32> to vector<4x256xf32>
    %34 = arith.mulf %30, %33 : vector<4x256xf32>
    %c0_26 = arith.constant 0 : index
    %c3_27 = arith.constant 3 : index
    %c0_28 = arith.constant 0 : index
    %c0_29 = arith.constant 0 : index
    %35 = vector.load %arg3[%c0_26, %c3_27, %c0_28, %c0_29] : memref<1x9x4x4xf32, #tpu.memory_space<vmem>>, vector<1x1x4x4xf32>
    %36 = vector.shape_cast %35 : vector<1x1x4x4xf32> to vector<4x4xf32>
    %cst_30 = arith.constant dense<0.000000e+00> : vector<4x256xf32>
    %37 = tpu.matmul %36, %34, %cst_30 {dimension_numbers = #tpu.dot_dimension_numbers<[1], [0], [0], [1], [0, 0, 1, 1], [], []>} : vector<4x4xf32>, vector<4x256xf32>, vector<4x256xf32> -> vector<4x256xf32>
    %38 = arith.addf %29, %37 : vector<4x256xf32>
    %c0_31 = arith.constant 0 : index
    %c4 = arith.constant 4 : index
    %c0_32 = arith.constant 0 : index
    %c0_33 = arith.constant 0 : index
    %39 = vector.load %arg3[%c0_31, %c4, %c0_32, %c0_33] : memref<1x9x4x4xf32, #tpu.memory_space<vmem>>, vector<1x1x4x4xf32>
    %40 = vector.shape_cast %39 : vector<1x1x4x4xf32> to vector<4x4xf32>
    %cst_34 = arith.constant dense<0.000000e+00> : vector<4x256xf32>
    %41 = tpu.matmul %40, %1, %cst_34 {dimension_numbers = #tpu.dot_dimension_numbers<[1], [0], [0], [1], [0, 0, 1, 1], [], []>} : vector<4x4xf32>, vector<4x256xf32>, vector<4x256xf32> -> vector<4x256xf32>
    %42 = arith.addf %38, %41 : vector<4x256xf32>
    %c255_i32 = arith.constant 255 : i32
    %43 = tpu.dynamic_rotate %1 by %c255_i32 dim 1 : vector<4x256xf32>, i32 -> vector<4x256xf32>
    %c5 = arith.constant 5 : index
    %c0_35 = arith.constant 0 : index
    %c0_36 = arith.constant 0 : index
    %44 = vector.load %arg4[%c5, %c0_35, %c0_36] : memref<9x1x256xf32, #tpu.memory_space<vmem>>, vector<1x1x256xf32>
    %45 = vector.shape_cast %44 : vector<1x1x256xf32> to vector<1x256xf32>
    %46 = vector.broadcast %45 : vector<1x256xf32> to vector<4x256xf32>
    %47 = arith.mulf %43, %46 : vector<4x256xf32>
    %c0_37 = arith.constant 0 : index
    %c5_38 = arith.constant 5 : index
    %c0_39 = arith.constant 0 : index
    %c0_40 = arith.constant 0 : index
    %48 = vector.load %arg3[%c0_37, %c5_38, %c0_39, %c0_40] : memref<1x9x4x4xf32, #tpu.memory_space<vmem>>, vector<1x1x4x4xf32>
    %49 = vector.shape_cast %48 : vector<1x1x4x4xf32> to vector<4x4xf32>
    %cst_41 = arith.constant dense<0.000000e+00> : vector<4x256xf32>
    %50 = tpu.matmul %49, %47, %cst_41 {dimension_numbers = #tpu.dot_dimension_numbers<[1], [0], [0], [1], [0, 0, 1, 1], [], []>} : vector<4x4xf32>, vector<4x256xf32>, vector<4x256xf32> -> vector<4x256xf32>
    %51 = arith.addf %42, %50 : vector<4x256xf32>
    %c241_i32 = arith.constant 241 : i32
    %52 = tpu.dynamic_rotate %1 by %c241_i32 dim 1 : vector<4x256xf32>, i32 -> vector<4x256xf32>
    %c6 = arith.constant 6 : index
    %c0_42 = arith.constant 0 : index
    %c0_43 = arith.constant 0 : index
    %53 = vector.load %arg4[%c6, %c0_42, %c0_43] : memref<9x1x256xf32, #tpu.memory_space<vmem>>, vector<1x1x256xf32>
    %54 = vector.shape_cast %53 : vector<1x1x256xf32> to vector<1x256xf32>
    %55 = vector.broadcast %54 : vector<1x256xf32> to vector<4x256xf32>
    %56 = arith.mulf %52, %55 : vector<4x256xf32>
    %c0_44 = arith.constant 0 : index
    %c6_45 = arith.constant 6 : index
    %c0_46 = arith.constant 0 : index
    %c0_47 = arith.constant 0 : index
    %57 = vector.load %arg3[%c0_44, %c6_45, %c0_46, %c0_47] : memref<1x9x4x4xf32, #tpu.memory_space<vmem>>, vector<1x1x4x4xf32>
    %58 = vector.shape_cast %57 : vector<1x1x4x4xf32> to vector<4x4xf32>
    %cst_48 = arith.constant dense<0.000000e+00> : vector<4x256xf32>
    %59 = tpu.matmul %58, %56, %cst_48 {dimension_numbers = #tpu.dot_dimension_numbers<[1], [0], [0], [1], [0, 0, 1, 1], [], []>} : vector<4x4xf32>, vector<4x256xf32>, vector<4x256xf32> -> vector<4x256xf32>
    %60 = arith.addf %51, %59 : vector<4x256xf32>
    %c240_i32 = arith.constant 240 : i32
    %61 = tpu.dynamic_rotate %1 by %c240_i32 dim 1 : vector<4x256xf32>, i32 -> vector<4x256xf32>
    %c7 = arith.constant 7 : index
    %c0_49 = arith.constant 0 : index
    %c0_50 = arith.constant 0 : index
    %62 = vector.load %arg4[%c7, %c0_49, %c0_50] : memref<9x1x256xf32, #tpu.memory_space<vmem>>, vector<1x1x256xf32>
    %63 = vector.shape_cast %62 : vector<1x1x256xf32> to vector<1x256xf32>
    %64 = vector.broadcast %63 : vector<1x256xf32> to vector<4x256xf32>
    %65 = arith.mulf %61, %64 : vector<4x256xf32>
    %c0_51 = arith.constant 0 : index
    %c7_52 = arith.constant 7 : index
    %c0_53 = arith.constant 0 : index
    %c0_54 = arith.constant 0 : index
    %66 = vector.load %arg3[%c0_51, %c7_52, %c0_53, %c0_54] : memref<1x9x4x4xf32, #tpu.memory_space<vmem>>, vector<1x1x4x4xf32>
    %67 = vector.shape_cast %66 : vector<1x1x4x4xf32> to vector<4x4xf32>
    %cst_55 = arith.constant dense<0.000000e+00> : vector<4x256xf32>
    %68 = tpu.matmul %67, %65, %cst_55 {dimension_numbers = #tpu.dot_dimension_numbers<[1], [0], [0], [1], [0, 0, 1, 1], [], []>} : vector<4x4xf32>, vector<4x256xf32>, vector<4x256xf32> -> vector<4x256xf32>
    %69 = arith.addf %60, %68 : vector<4x256xf32>
    %c239_i32 = arith.constant 239 : i32
    %70 = tpu.dynamic_rotate %1 by %c239_i32 dim 1 : vector<4x256xf32>, i32 -> vector<4x256xf32>
    %c8 = arith.constant 8 : index
    %c0_56 = arith.constant 0 : index
    %c0_57 = arith.constant 0 : index
    %71 = vector.load %arg4[%c8, %c0_56, %c0_57] : memref<9x1x256xf32, #tpu.memory_space<vmem>>, vector<1x1x256xf32>
    %72 = vector.shape_cast %71 : vector<1x1x256xf32> to vector<1x256xf32>
    %73 = vector.broadcast %72 : vector<1x256xf32> to vector<4x256xf32>
    %74 = arith.mulf %70, %73 : vector<4x256xf32>
    %c0_58 = arith.constant 0 : index
    %c8_59 = arith.constant 8 : index
    %c0_60 = arith.constant 0 : index
    %c0_61 = arith.constant 0 : index
    %75 = vector.load %arg3[%c0_58, %c8_59, %c0_60, %c0_61] : memref<1x9x4x4xf32, #tpu.memory_space<vmem>>, vector<1x1x4x4xf32>
    %76 = vector.shape_cast %75 : vector<1x1x4x4xf32> to vector<4x4xf32>
    %cst_62 = arith.constant dense<0.000000e+00> : vector<4x256xf32>
    %77 = tpu.matmul %76, %74, %cst_62 {dimension_numbers = #tpu.dot_dimension_numbers<[1], [0], [0], [1], [0, 0, 1, 1], [], []>} : vector<4x4xf32>, vector<4x256xf32>, vector<4x256xf32> -> vector<4x256xf32>
    %78 = arith.addf %69, %77 : vector<4x256xf32>
    %79 = vector.shape_cast %78 : vector<4x256xf32> to vector<1x4x256xf32>
    %cst_63 = arith.constant dense<0.000000e+00> : vector<1xf32>
    %80 = vector.multi_reduction <add>, %79, %cst_63 [1, 2] : vector<1x4x256xf32> to vector<1xf32>
    %81 = vector.shape_cast %80 : vector<1xf32> to vector<1x1x1xf32>
    %82 = vector.extract %81[0, 0, 0] : f32 from vector<1x1x1xf32>
    %83 = vector.broadcast %82 : f32 to vector<1x1xf32>
    %84 = arith.mulf %78, %78 : vector<4x256xf32>
    %85 = vector.shape_cast %84 : vector<4x256xf32> to vector<1x4x256xf32>
    %cst_64 = arith.constant dense<0.000000e+00> : vector<1xf32>
    %86 = vector.multi_reduction <add>, %85, %cst_64 [1, 2] : vector<1x4x256xf32> to vector<1xf32>
    %87 = vector.shape_cast %86 : vector<1xf32> to vector<1x1x1xf32>
    %88 = vector.extract %87[0, 0, 0] : f32 from vector<1x1x1xf32>
    %89 = vector.broadcast %88 : f32 to vector<1x1xf32>
    %cst_65 = arith.constant 9.765625E-4 : f32
    %90 = vector.broadcast %cst_65 : f32 to vector<1x1xf32>
    %91 = arith.mulf %83, %90 : vector<1x1xf32>
    %cst_66 = arith.constant 9.765625E-4 : f32
    %92 = vector.broadcast %cst_66 : f32 to vector<1x1xf32>
    %93 = arith.mulf %89, %92 : vector<1x1xf32>
    %94 = arith.mulf %91, %91 : vector<1x1xf32>
    %95 = arith.subf %93, %94 : vector<1x1xf32>
    %cst_67 = arith.constant 0.000000e+00 : f32
    %96 = vector.broadcast %cst_67 : f32 to vector<1x1xf32>
    %97 = arith.maximumf %95, %96 : vector<1x1xf32>
    %cst_68 = arith.constant 9.99999974E-6 : f32
    %98 = vector.broadcast %cst_68 : f32 to vector<1x1xf32>
    %99 = arith.addf %97, %98 : vector<1x1xf32>
    %100 = math.rsqrt %99 : vector<1x1xf32>
    %c0_69 = arith.constant 0 : index
    %c0_70 = arith.constant 0 : index
    %c0_71 = arith.constant 0 : index
    %c0_72 = arith.constant 0 : index
    %101 = vector.load %arg5[%c0_69, %c0_70, %c0_71, %c0_72] : memref<1x1x4x1xf32, #tpu.memory_space<vmem>>, vector<1x1x4x1xf32>
    %102 = vector.shape_cast %101 : vector<1x1x4x1xf32> to vector<4x1xf32>
    %c0_73 = arith.constant 0 : index
    %c0_74 = arith.constant 0 : index
    %c0_75 = arith.constant 0 : index
    %c0_76 = arith.constant 0 : index
    %103 = vector.load %arg6[%c0_73, %c0_74, %c0_75, %c0_76] : memref<1x1x4x1xf32, #tpu.memory_space<vmem>>, vector<1x1x4x1xf32>
    %104 = vector.shape_cast %103 : vector<1x1x4x1xf32> to vector<4x1xf32>
    %105 = vector.broadcast %91 : vector<1x1xf32> to vector<4x256xf32>
    %106 = arith.subf %78, %105 : vector<4x256xf32>
    %107 = vector.broadcast %100 : vector<1x1xf32> to vector<4x1xf32>
    %108 = arith.mulf %107, %102 : vector<4x1xf32>
    %109 = vector.broadcast %108 : vector<4x1xf32> to vector<4x256xf32>
    %110 = arith.mulf %106, %109 : vector<4x256xf32>
    %111 = vector.broadcast %104 : vector<4x1xf32> to vector<4x256xf32>
    %112 = arith.addf %110, %111 : vector<4x256xf32>
    %113 = arith.negf %112 : vector<4x256xf32>
    %114 = math.exp %113 : vector<4x256xf32>
    %cst_77 = arith.constant 1.000000e+00 : f32
    %115 = vector.broadcast %cst_77 : f32 to vector<4x256xf32>
    %116 = arith.addf %115, %114 : vector<4x256xf32>
    %117 = arith.divf %115, %116 : vector<4x256xf32>
    %118 = arith.mulf %112, %117 : vector<4x256xf32>
    %119 = vector.shape_cast %118 : vector<4x256xf32> to vector<1x1x4x256xf32>
    %c0_78 = arith.constant 0 : index
    %c0_79 = arith.constant 0 : index
    %c0_80 = arith.constant 0 : index
    %c0_81 = arith.constant 0 : index
    %120 = vector.load %arg7[%c0_78, %c0_79, %c0_80, %c0_81] : memref<1x1x4x256xf32, #tpu.memory_space<vmem>>, vector<1x1x4x256xf32>
    tpu.vector_store %arg7[%c0_78, %c0_79, %c0_80, %c0_81], %119 {strides = array<i32>} : memref<1x1x4x256xf32, #tpu.memory_space<vmem>>, vector<1x1x4x256xf32>,
    return
  }
  func.func @transform_0(%arg0: i32, %arg1: i32) -> (i32, i32, i32) {
    %c0_i32 = arith.constant 0 : i32
    %c0_i32_0 = arith.constant 0 : i32
    %c0_i32_1 = arith.constant 0 : i32
    return %arg0, %c0_i32, %c0_i32_0 : i32, i32, i32
  }
  func.func @transform_1(%arg0: i32, %arg1: i32) -> (i32, i32, i32, i32) {
    %c0_i32 = arith.constant 0 : i32
    %c0_i32_0 = arith.constant 0 : i32
    %c0_i32_1 = arith.constant 0 : i32
    %c0_i32_2 = arith.constant 0 : i32
    return %arg1, %c0_i32, %c0_i32_0, %c0_i32_1 : i32, i32, i32, i32
  }
  func.func @transform_2(%arg0: i32, %arg1: i32) -> (i32, i32, i32) {
    %c0_i32 = arith.constant 0 : i32
    %c0_i32_0 = arith.constant 0 : i32
    %c0_i32_1 = arith.constant 0 : i32
    %c0_i32_2 = arith.constant 0 : i32
    return %c0_i32, %c0_i32_0, %c0_i32_1 : i32, i32, i32
  }
  func.func @transform_3(%arg0: i32, %arg1: i32) -> (i32, i32, i32, i32) {
    %c0_i32 = arith.constant 0 : i32
    %c0_i32_0 = arith.constant 0 : i32
    %c0_i32_1 = arith.constant 0 : i32
    return %arg0, %arg1, %c0_i32, %c0_i32_0 : i32, i32, i32, i32
  }
  func.func @transform_4(%arg0: i32, %arg1: i32) -> (i32, i32, i32, i32) {
    %c0_i32 = arith.constant 0 : i32
    %c0_i32_0 = arith.constant 0 : i32
    %c0_i32_1 = arith.constant 0 : i32
    return %arg0, %arg1, %c0_i32, %c0_i32_0 : i32, i32, i32, i32
  }
  func.func @transform_5(%arg0: i32, %arg1: i32) -> (i32, i32, i32, i32) {
    %c0_i32 = arith.constant 0 : i32
    %c0_i32_0 = arith.constant 0 : i32
    %c0_i32_1 = arith.constant 0 : i32
    return %arg0, %arg1, %c0_i32, %c0_i32_0 : i32, i32, i32, i32
  }
}

</mosaic_0001>

<bundles_post_ra>
// kernel: tpu_custom_call.1
= control target key start
LH: loop header
LB: loop body
LE: loop exit
PB: predicated region body
PF: predicated region fallthrough
CT: control target
= control target key end

     0   :  { %10 = vsyncpa [#allocation3], 0  ;;  %s2048_s0 = inlined_call_operand.vmem [shape: f32[2,4,256], index: 0, kind: input, shape index: {}]   ;;  %s2049_s1 = inlined_call_operand.vmem [shape: f32[2,9,4,4], index: 1, kind: input, shape index: {}]   ;;  %s2050_s2 = inlined_call_operand.vmem [shape: f32[9,1,256], index: 2, kind: input, shape index: {}]   ;;  %s2051_s3 = inlined_call_operand.vmem [shape: f32[2,2,4,1], index: 3, kind: input, shape index: {}]   ;;  %s2052_s4 = inlined_call_operand.vmem [shape: f32[2,2,4,1], index: 4, kind: input, shape index: {}]   ;;  %s2053_s5 = inlined_call_operand.hbm [shape: f32[2,2,4,256], index: 5, kind: output, shape index: {}]  }
   0x1   :  { %12 = vsyncpa [#allocation3 + $0x1], 0  ;;  %s1778_s18 = smov 0   ;;  %s1780_s19 = smov 0  }
   0x2   :  { %s1782_s20 = smov 0   ;;  %s1784_s21 = smov 0  }
   0x3   :  { %s1786_s22 = smov 0   ;;  %s1788_s23 = smov 0  }
   0x4   :  { %s1790_s24 = smov 0   ;;  %s1792_s25 = smov 0  }
   0x5 LB: > { %s1462_s26 = sadd.s32 4294967295, %s1735_s25   ;;  %s1463_s27 = sadd.s32 4294967294, %s1735_s25   ;;  %s1735_s25 = sphi %s1792_s25, %s18_s25   ;;  %s1731_s24 = sphi %s1790_s24, %s2062_s24   ;;  %s1727_s23 = sphi %s1788_s23, %s2061_s23   ;;  %s1723_s22 = sphi %s1786_s22, %s2060_s22   ;;  %s1719_s21 = sphi %s1784_s21, %s2059_s21   ;;  %s1715_s20 = sphi %s1782_s20, %s2058_s20   ;;  %s1711_s19 = sphi %s1780_s19, %s2057_s19   ;;  %s1707_s18 = sphi %s1778_s18, %s2056_s18  }
   0x6   : > { %s27_s28 = sadd.s32 1, %s1727_s23  ;;  %s30_s29 = sadd.s32 1, %s1731_s24 }
   0x7   : > { %p28_p0 = scmp.ge.s32.totalorder %s27_s28, 2  ;;  %p178_p1 = scmp.ne.s32.totalorder %s1715_s20, %s1711_s19 }
   0x8   : > { %p179_p2 = scmp.eq.s32.totalorder %s1462_s26, 3  ;;  %p184_p5 = scmp.ne.s32.totalorder %s1711_s19, %s1707_s18 }
   0x9   : > { %s2064_s28 = smov (%p28_p0, %s27_s28), 0  ;;  %s2066_s29 = smov (!%p28_p0, %s30_s29), %s1731_s24 }
   0xa   : > { %s164_s30 = ssub.s32 %s1727_s23, %s2064_s28  ;;  %p1829_p3 = por %p179_p2, %p178_p1 }
   0xb   : > { %p32_p4 = scmp.ge.s32.totalorder %s2066_s29, 2  ;;  %p185_p6 = scmp.eq.s32.totalorder %s1463_s27, 3 }
   0xc   : > { %p1466_p7 = scmp.ge.s32.totalorder %s1735_s25, 1  ;;  %p244_p9 = scmp.lt.s32.totalorder %s1735_s25, 5 }
   0xd   : > { %s2068_s29 = smov (%p32_p4, %s2066_s29), 0  ;;  %p1838_p8 = por %p185_p6, %p184_p5 }
   0xe   : > { %s163_s8 = ssub.s32 %s1731_s24, %s2068_s29  ;;  %s168_s9 = sadd.s32 1, %s1715_s20 }
   0xf   : > { %s165_s10 = sor.u32 %s164_s30, %s163_s8  ;;  %p245_p10 = pnand %p1466_p7, %p244_p9 }
  0x10   : > { %p166_p11 = scmp.eq.s32.totalorder %s165_s10, 0  ;;  %p293_p12 = scmp.lt.s32.totalorder (!%p245_p10), %s1723_s22, 1  ;;  %v1737_v0 = vmov (!%p245_p10), 0.0   ;;  %vm375_vm0 = vcmask (!%p245_p10), 1043456   ;;  %vm371_vm1 = vcmask (!%p245_p10), 31744   ;;  %v327_v4 = vlaneseq (!%p245_p10) }
  0x11   : > { %248 = sbr.rel (%p245_p10) target bundleno = 800 (0x320), region = 40  ;;  %818 = vmatprep.mubr.f32.mxu0 (!%p245_p10), %v1737_v0  ;;  %446 = vmatprep.mubr.f32.mxu1 (!%p245_p10), %v1737_v0  ;;  %p298_p13 = scmp.lt.s32.totalorder (!%p245_p10), %s1719_s21, 1  ;;  %v1497_v9 = vld [vmem:[%s2050_s2 + $0xa] sm:$0x3] (!%p245_p10)  ;;  %v1475_v10 = vld [vmem:[%s2050_s2 + $0x2] sm:$0x3] (!%p245_p10) }
  0x12   : > { %s1847_s11 = scalar_select %p166_p11, %s1715_s20, %s168_s9  }
  0x13   : > { %s1738_s17 = smov (!%p245_p10), 127   ;;  %s1739_s26 = smov (!%p245_p10), 16   ;;  %v335_v5 = vshrl.u32 (!%p245_p10), %v327_v4, 7  ;;  %v1874_v6 = vand.u32 (!%p245_p10), 127, %v327_v4  ;;  %v332_v13 = vld [vmem:[%s2050_s2] sm:$0x3] (!%p245_p10) }
  0x14   : > { %s1741_s14 = smov (!%p245_p10), 113   ;;  %s1742_s15 = smov (!%p245_p10), 15   ;;  %v1502_v30 = vld [vmem:[%s2050_s2 + $0xc] sm:$0x3] (!%p245_p10)  ;;  %v1483_v41 = vld [vmem:[%s2050_s2 + $0x4] sm:$0x3] (!%p245_p10) }
  0x15   : > { %v1876_v7 = vsub.s32 (!%p245_p10), 0, %v335_v5  ;;  %v1878_v8 = vsub.s32 (!%p245_p10), 1, %v335_v5  ;;  %vm831_vm2 = vcmp.lt.s32.totalorder (!%p245_p10), %v1874_v6, 127  ;;  %vm351_vm3 = vcmp.lt.s32.totalorder (!%p245_p10), %v1874_v6, 16  ;;  %v1507_v50 = vld [vmem:[%s2050_s2 + $0xe] sm:$0x3] (!%p245_p10) }
  0x16   : > { %vm329_vm4 = vcmp.lt.s32.totalorder (!%p245_p10), %v1874_v6, 17  ;;  %vm937_vm5 = vcmp.lt.s32.totalorder (!%p245_p10), %v1874_v6, 113  ;;  %vm537_vm6 = vcmp.lt.s32.totalorder (!%p245_p10), %v1874_v6, 15  ;;  %vm1043_vm7 = vcmp.lt.s32.totalorder (!%p245_p10), %v1874_v6, 112  ;;  %v1488_v61 = vld [vmem:[%s2050_s2 + $0x6] sm:$0x3] (!%p245_p10) }
  0x17   : > { %v840_v14 = vrot.slane (!%p245_p10), %v1497_v9, %v1876_v7  ;;  %v844_v15 = vrot.slane (!%p245_p10), %v1497_v9, %v1878_v8  ;;  %v360_v16 = vrot.slane (!%p245_p10), %v1475_v10, %v1876_v7  ;;  %v364_v17 = vrot.slane (!%p245_p10), %v1475_v10, %v1878_v8  ;;  %v1512_v10 = vld [vmem:[%s2050_s2 + $0x10] sm:$0x3] (!%p245_p10) }
  0x18   : > { %s1853_s12 = scalar_select %p293_p12, %s1723_s22, 1  ;;  %v337_v20 = vrot.slane %v332_v13, %v1876_v7  ;;  %v341_v21 = vrot.slane %v332_v13, %v1878_v8  ;;  %v946_v37 = vrot.slane %v1502_v30, %v1876_v7  ;;  %v950_v40 = vrot.slane %v1502_v30, %v1878_v8 }
  0x19   : > { %s1861_s27 = scalar_select %p298_p13, %s1719_s21, 1  ;;  %v546_v48 = vrot.slane %v1483_v41, %v1876_v7  ;;  %v550_v49 = vrot.slane %v1483_v41, %v1878_v8  ;;  %v1052_v57 = vrot.slane %v1507_v50, %v1876_v7  ;;  %v1056_v60 = vrot.slane %v1507_v50, %v1878_v8 }
  0x1a   : > { %s1525_s13 = sshll.u32 %s1853_s12, 3  ;;  %vm643_vm8 = vcmp.lt.s32.totalorder %v1874_v6, 1  ;;  %v652_v5 = vrot.slane %v1488_v61, %v1876_v7  ;;  %v656_v9 = vrot.slane %v1488_v61, %v1878_v8  ;;  %vm1149_vm9 = vcmp.lt.s32.totalorder %v1874_v6, 111 }
  0x1b   : > { %s297_s16 = scalar_lea.vmem %s2048_s0, %s1525_s13  ;;  %s1542_s30 = smul.u32 36, %s1861_s27 }
  0x1c   : > { %v319_v1 = vld [vmem:[%s297_s16] sm:$0xff]  ;;  %s1740_s13 = smov 17   ;;  %s1743_s16 = smov 112  }
  0x1d   : > { %827 = vrot.lane.b32.xlu1 %v319_v1, %s1738_s17  ;;  %347 = vrot.lane.b32.xlu0 %v319_v1, %s1739_s26  ;;  %v321_v2 = vcombine.high %v319_v1, %v319_v1  ;;  %s1869_s10 = scalar_lea.vmem %s2049_s1, %s1542_s30 }
  0x1e   : > { %v1493_v3 = vld [vmem:[%s1869_s10 + $0x10] sm:$0xf]  ;;  %v1476_v31 = vld [vmem:[%s1869_s10 + $0x4] sm:$0xf]  ;;  %v1498_v32 = vld [vmem:[%s1869_s10 + $0x14] sm:$0xf] }
  0x1f   : > { %1494 = vmatprep.subr.msk.mxu0 %vm375_vm0, %v321_v2  ;;  %v346_v51 = vld [vmem:[%s1869_s10] sm:$0xf]  ;;  %v1503_v52 = vld [vmem:[%s1869_s10 + $0x18] sm:$0xf] }
  0x20   : > { %1495 = vmatpush1.msk.msra.mxu0 %vm375_vm0, %v319_v1 }
  0x21   : > { %829 = vrot.lane.b32.xlu1 %v321_v2, %s1738_s17  ;;  %349 = vrot.lane.b32.xlu0 %v321_v2, %s1739_s26  ;;  %s1744_s17 = smov 1   ;;  %s1745_s26 = smov 111  }
  0x22   : > { %1496 = vmatmul.mubr.msk.f32.vlgmr.msra.gmra.mrb[0].mxu0 %vm371_vm1, %v1493_v3 }
  0x23   : > { %924 = vmatprep.mubr.f32.mxu0 %v1737_v0 }
  0x25   : > { %325 = vrot.lane.b32.xlu1 %v321_v2, %s1740_s13  ;;  %323 = vrot.lane.b32.xlu0 %v319_v1, %s1740_s13 }
  0x29   : > { %935 = vrot.lane.b32.xlu1 %v321_v2, %s1741_s14  ;;  %933 = vrot.lane.b32.xlu0 %v319_v1, %s1741_s14 }
  0x2d   : > { %535 = vrot.lane.b32.xlu1 %v321_v2, %s1742_s15  ;;  %533 = vrot.lane.b32.xlu0 %v319_v1, %s1742_s15 }
  0x31   : > { %1041 = vrot.lane.b32.xlu1 %v321_v2, %s1743_s16  ;;  %1039 = vrot.lane.b32.xlu0 %v319_v1, %s1743_s16  ;;  %s290_s16 = sand.u32 1, %s1711_s19  }
  0x35   : > { %641 = vrot.lane.b32.xlu1 %v321_v2, %s1744_s17  ;;  %639 = vrot.lane.b32.xlu0 %v319_v1, %s1744_s17 }
  0x39   : > { %1147 = vrot.lane.b32.xlu1 %v321_v2, %s1745_s26  ;;  %1145 = vrot.lane.b32.xlu0 %v319_v1, %s1745_s26 }
  0x8f   : > { %v828_v11 = vpop.permute.xlu1 %827  ;;  %v348_v12 = vpop.permute.xlu0 %347 }
  0x93   : > { %v830_v18 = vpop.permute.xlu1 %829  ;;  %v350_v19 = vpop.permute.xlu0 %349 }
  0x94   : > { %v832_v22 = vsel %vm831_vm2, %v828_v11, %v830_v18  ;;  %v833_v23 = vsel %vm831_vm2, %v830_v18, %v828_v11  ;;  %v352_v24 = vsel %vm351_vm3, %v348_v12, %v350_v19  ;;  %v353_v25 = vsel %vm351_vm3, %v350_v19, %v348_v12  ;;  %v1484_v11 = vld [vmem:[%s1869_s10 + $0x8] sm:$0xf]  ;;  %v1508_v12 = vld [vmem:[%s1869_s10 + $0x1c] sm:$0xf] }
  0x95   : > { %v847_v26 = vmul.f32 %v840_v14, %v832_v22  ;;  %v848_v27 = vmul.f32 %v844_v15, %v833_v23  ;;  %v367_v28 = vmul.f32 %v360_v16, %v353_v25  ;;  %v368_v29 = vmul.f32 %v364_v17, %v352_v24 }
  0x96   : > { %v1158_v17 = vrot.slane %v1512_v10, %v1876_v7 }
  0x97   : > { %v326_v33 = vpop.permute.xlu1 %325  ;;  %1477 = vmatprep.subr.msk.mxu1 %vm375_vm0, %v368_v29  ;;  %v324_v34 = vpop.permute.xlu0 %323  ;;  %1499 = vmatprep.subr.msk.mxu0 %vm375_vm0, %v848_v27  ;;  %v1513_v27 = vld [vmem:[%s1869_s10 + $0x20] sm:$0xf] }
  0x98   : > { %v330_v35 = vsel %vm329_vm4, %v324_v34, %v326_v33  ;;  %v331_v36 = vsel %vm329_vm4, %v326_v33, %v324_v34  ;;  %1478 = vmatpush1.msk.msra.mxu1 %vm375_vm0, %v367_v28  ;;  %1500 = vmatpush1.msk.msra.mxu0 %vm375_vm0, %v847_v26  ;;  %v1489_v26 = vld [vmem:[%s1869_s10 + $0xc] sm:$0xf]  ;;  %s1471_s10 = sshll.u32 %s1853_s12, 1 }
  0x99   : > { %v344_v38 = vmul.f32 %v337_v20, %v331_v36  ;;  %v345_v39 = vmul.f32 %v341_v21, %v330_v35  ;;  %1479 = vmatmul.mubr.msk.f32.vlgmr.msra.gmra.mrb[0].mxu1 %vm371_vm1, %v1476_v31  ;;  %1501 = vmatmul.mubr.msk.f32.vlgmr.msra.gmra.mrb[0].mxu0 %vm371_vm1, %v1498_v32  ;;  %v1162_v20 = vrot.slane %v1512_v10, %v1878_v8  ;;  %s1976_s17 = sadd.s32 %s1471_s10, %s1861_s27  ;;  %s1467_s10 = sshll.u32 %s290_s16, 3 }
  0x9a   : > { %526 = vmatprep.mubr.f32.mxu1 %v1737_v0  ;;  %1030 = vmatprep.mubr.f32.mxu0 %v1737_v0  ;;  %s1472_s26 = sshll.u32 %s1976_s17, 2  ;;  %s1520_s17 = sshll.u32 %s1719_s21, 1 }
  0x9b   : > { %v936_v42 = vpop.permute.xlu1 %935  ;;  %1480 = vmatprep.subr.msk.mxu1 %vm375_vm0, %v345_v39  ;;  %v934_v43 = vpop.permute.xlu0 %933  ;;  %v1746_v39 = vmov 0   ;;  %s318_s9 = scalar_lea.vmem %s2052_s4, %s1472_s26  ;;  %s310_s15 = scalar_lea.vmem %s2051_s3, %s1472_s26 }
  0x9c   : > { %v938_v44 = vsel %vm937_vm5, %v934_v43, %v936_v42  ;;  %v939_v45 = vsel %vm937_vm5, %v936_v42, %v934_v43  ;;  %1481 = vmatpush1.msk.msra.mxu1 %vm375_vm0, %v344_v38  ;;  %1628 = vset.pattern.permute.xlu0 %v1746_v39  ;;  %s1521_s26 = sshll.u32 %s1723_s22, 2  ;;  %s1325_s21 = scalar_lea.sflag [#allocation3], %s290_s16 }
  0x9d   : > { %v953_v46 = vmul.f32 %v946_v37, %v938_v44  ;;  %v954_v47 = vmul.f32 %v950_v40, %v939_v45  ;;  %1629 = vset.pattern.permute.xlu1 %v1746_v39  ;;  %v1287_v40 = vld [vmem:[%s318_s9] sm:$0xf]  ;;  %s1337_s30 = sadd.s32 %s1521_s26, %s1520_s17  ;;  %s292_s9 = scalar_lea.vmem [#allocation2], %s1467_s10 }
  0x9e   : > { %s1522_s8 = sshll.u32 %s1337_s30, 6 }
  0x9f   : > { %v536_v53 = vpop.permute.xlu1 %535  ;;  %v534_v54 = vpop.permute.xlu0 %533  ;;  %1504 = vmatprep.subr.msk.mxu0 %vm375_vm0, %v954_v47  ;;  %s1995_s14 = scalar_lea.hbm %s2053_s5, %s1522_s8 }
  0xa0   : > { %v538_v55 = vsel %vm537_vm6, %v534_v54, %v536_v53  ;;  %v539_v56 = vsel %vm537_vm6, %v536_v53, %v534_v54  ;;  %1505 = vmatpush1.msk.msra.mxu0 %vm375_vm0, %v953_v46 }
  0xa1   : > { %v553_v58 = vmul.f32 %v546_v48, %v539_v56  ;;  %v554_v59 = vmul.f32 %v550_v49, %v538_v55  ;;  %1482 = vmatmul.mubr.msk.f32.vlgmr.msra.gmra.mrb[0].mxu1 %vm371_vm1, %v346_v51  ;;  %1506 = vmatmul.mubr.msk.f32.vlgmr.msra.gmra.mrb[0].mxu0 %vm371_vm1, %v1503_v52 }
  0xa2   : > { %630 = vmatprep.mubr.f32.mxu1 %v1737_v0  ;;  %1136 = vmatprep.mubr.f32.mxu0 %v1737_v0 }
  0xa3   : > { %v1042_v62 = vpop.permute.xlu1 %1041  ;;  %1485 = vmatprep.subr.msk.mxu1 %vm375_vm0, %v554_v59  ;;  %v1040_v63 = vpop.permute.xlu0 %1039 }
  0xa4   : > { %v1044_v1 = vsel %vm1043_vm7, %v1040_v63, %v1042_v62  ;;  %v1045_v2 = vsel %vm1043_vm7, %v1042_v62, %v1040_v63  ;;  %1486 = vmatpush1.msk.msra.mxu1 %vm375_vm0, %v553_v58  ;;  %v1286_v63 = vld [vmem:[%s310_s15] sm:$0xf]  ;;  %s1747_s15 = smov [#allocation2]  }
  0xa5   : > { %v1059_v3 = vmul.f32 %v1052_v57, %v1044_v1  ;;  %v1060_v4 = vmul.f32 %v1056_v60, %v1045_v2  ;;  %s1645_s10 = sshll.u32 %s1747_s15, 4  ;;  %s1646_s10 = int_to_ptr.vmem [resolvable:$false] %s1645_s10 }
  0xa6   : > { %s1647_s17 = scalar_lea.vmem %s1646_s10, 256 }
  0xa7   : > { %v642_v13 = vpop.permute.xlu1 %641  ;;  %v640_v14 = vpop.permute.xlu0 %639  ;;  %1509 = vmatprep.subr.msk.mxu0 %vm375_vm0, %v1060_v4 }
  0xa8   : > { %v644_v15 = vsel %vm643_vm8, %v640_v14, %v642_v13  ;;  %v645_v16 = vsel %vm643_vm8, %v642_v13, %v640_v14  ;;  %1510 = vmatpush1.msk.msra.mxu0 %vm375_vm0, %v1059_v3 }
  0xa9   : > { %v659_v18 = vmul.f32 %v652_v5, %v645_v16  ;;  %v660_v19 = vmul.f32 %v656_v9, %v644_v15  ;;  %1487 = vmatmul.mubr.msk.f32.vlgmr.msra.gmra.mrb[0].mxu1 %vm371_vm1, %v1484_v11  ;;  %1511 = vmatmul.mubr.msk.f32.vlgmr.msra.gmra.mrb[0].mxu0 %vm371_vm1, %v1508_v12 }
  0xaa   : > { %736 = vmatprep.mubr.f32.mxu1 %v1737_v0  ;;  %1242 = vmatprep.mubr.f32.mxu0 %v1737_v0 }
  0xab   : > { %v1148_v21 = vpop.permute.xlu1 %1147  ;;  %1490 = vmatprep.subr.msk.mxu1 %vm375_vm0, %v660_v19  ;;  %v1146_v7 = vpop.permute.xlu0 %1145 }
  0xac   : > { %v1150_v22 = vsel %vm1149_vm9, %v1146_v7, %v1148_v21  ;;  %v1151_v23 = vsel %vm1149_vm9, %v1148_v21, %v1146_v7  ;;  %1491 = vmatpush1.msk.msra.mxu1 %vm375_vm0, %v659_v18 }
  0xad   : > { %v1165_v24 = vmul.f32 %v1158_v17, %v1150_v22  ;;  %v1166_v25 = vmul.f32 %v1162_v20, %v1151_v23 }
  0xaf   : > { %1514 = vmatprep.subr.msk.mxu0 %vm375_vm0, %v1166_v25 }
  0xb0   : > { %1515 = vmatpush1.msk.msra.mxu0 %vm375_vm0, %v1165_v24 }
  0xb1   : > { %1492 = vmatmul.mubr.msk.f32.vlgmr.msra.gmra.mrb[0].mxu1 %vm371_vm1, %v1489_v26  ;;  %1516 = vmatmul.mubr.msk.f32.vlgmr.msra.gmra.mrb[0].mxu0 %vm371_vm1, %v1513_v27 }
 0x184   : > { %v738_v0 = vpop.f32.mrb[0].mxu1  ;;  %v1244_v6 = vpop.f32.mrb[0].mxu0 }
 0x185   : > { %v1526_v8 = vadd.f32 %v1244_v6, %v738_v0  ;;  %v740_v28 = vpop.f32.mrb[1].mxu1  ;;  %v1246_v29 = vpop.f32.mrb[1].mxu0 }
 0x186   : > { %v1527_v30 = vadd.f32 %v1246_v29, %v740_v28 }
 0x187   : > { %v1251_v31 = vsel %vm375_vm0, %v1526_v8, 0.0  ;;  %v1264_v32 = vmul.f32 %v1526_v8, %v1526_v8 }
 0x188   : > { %v1252_v33 = vsel %vm375_vm0, %v1527_v30, 0.0  ;;  %v1265_v34 = vmul.f32 %v1527_v30, %v1527_v30 }
 0x189   : > { %v1253_v35 = vadd.f32 %v1252_v33, %v1251_v31  ;;  %v1266_v36 = vsel %vm375_vm0, %v1264_v32, 0.0 }
 0x18a   : > { %v1267_v37 = vsel %vm375_vm0, %v1265_v34, 0.0 }
 0x18b   : > { %1254 = vadd.xlane.f32.xlu0 %v1253_v35  ;;  %v1268_v38 = vadd.f32 %v1267_v37, %v1266_v36 }
 0x18d   : > { %1269 = vadd.xlane.f32.xlu1 %v1268_v38 }
 0x19e   : > { %1300 = vperm.xlu1 %1629, %v1287_v40  }
 0x218   : > { %v1255_v41 = vpop.xlane.xlu0 %1254 }
 0x219   : > { %v1256_v42 = vrot.slane %v1255_v41, 4 }
 0x21a   : > { %v1270_v43 = vpop.xlane.xlu1 %1269 }
 0x21b   : > { %v1257_v44 = vadd.f32 %v1256_v42, %v1255_v41  ;;  %v1271_v45 = vrot.slane %v1270_v43, 4 }
 0x21d   : > { %v1258_v46 = vrot.slane %v1257_v44, 2  ;;  %v1272_v47 = vadd.f32 %v1271_v45, %v1270_v43 }
 0x21e   : > { %v1301_v9 = vpop.permute.xlu1 %1300 }
 0x21f   : > { %v1273_v48 = vrot.slane %v1272_v47, 2  ;;  %v1259_v49 = vadd.f32 %v1258_v46, %v1257_v44 }
 0x221   : > { %v1260_v50 = vrot.slane %v1259_v49, 1  ;;  %v1274_v51 = vadd.f32 %v1273_v48, %v1272_v47 }
 0x223   : > { %v1261_v52 = vadd.f32 %v1260_v50, %v1259_v49  ;;  %v1275_v53 = vrot.slane %v1274_v51, 1 }
 0x225   : > { %1543 = vpush %v1261_v52  ;;  %v1276_v54 = vadd.f32 %v1275_v53, %v1274_v51 }
 0x227   : > { %1545 = vpush %v1276_v54 }
 0x256   : > { %s1544_s12 = spop %1543 }
 0x257   : > { %v1263_v55 = vstv %s1544_s12  ;;  %s1341_s12 = sshll.u32 %s292_s9, 4  ;;  %s1997_s12 = int_to_ptr.vmem [resolvable:$true] %s1341_s12 }
 0x258   : > { %v1279_v56 = vmul.f32 0.0009765625, %v1263_v55  ;;  %s1546_s27 = spop %1545  ;;  %s1641_s22 = scalar_lea.vmem %s1997_s12, 128 }
 0x259   : > { %v1278_v57 = vstv %s1546_s27  ;;  %p1642_p0 = scmp.ne.s32.totalorder %s1997_s12, %s1641_s22  ;;  %p1648_p4 = scmp.lt.s32.totalorder %s1997_s12, %s1646_s10 }
 0x25a   : > { %v1280_v58 = vmul.f32 0.0009765625, %v1278_v57  ;;  %v1281_v59 = vmul.f32 %v1279_v56, %v1279_v56  ;;  %v1288_v3 = vsub.f32 %v1526_v8, %v1279_v56  ;;  %v1289_v4 = vsub.f32 %v1527_v30, %v1279_v56  ;;  %p1649_p5 = scmp.lt.s32.totalorder %s1647_s17, %s1641_s22 }
 0x25b   : > { %p1643_p1 = pnand %p1642_p0, %p1829_p3 }
 0x25c   : > { %v1282_v60 = vsub.f32 %v1280_v58, %v1281_v59  ;;  %p1650_p6 = por %p1649_p5, %p1648_p4 }
 0x25d   : > { %p1644_p2 = pneg %p1643_p1 }
 0x25e   : > { %v1283_v61 = vmax.f32 %v1282_v60, 0.0 }
 0x25f   : > { %p1651_p7 = pnand %p1650_p6, %p1644_p2 }
 0x260   : > { %v1284_v62 = vadd.f32 1e-05, %v1283_v61 }
 0x262   : > { %1631 = vrsqrt.f32 %v1284_v62 }
 0x26c   : > { %v1632_v1 = vpop.eup %1631 }
 0x26d   : > { %v1290_v2 = vmul.f32 %v1632_v1, %v1286_v63 }
 0x26f   : > { %1293 = vperm.xlu0 %1628, %v1290_v2  }
 0x2ee   : > { %v1294_v5 = vpop.permute.xlu0 %1293 }
 0x2ef   : > { %v1296_v10 = vmul.f32 %v1294_v5, %v1288_v3  ;;  %v1297_v11 = vmul.f32 %v1294_v5, %v1289_v4 }
 0x2f1   : > { %v1303_v12 = vadd.f32 %v1301_v9, %v1296_v10  ;;  %v1304_v13 = vadd.f32 %v1301_v9, %v1297_v11 }
 0x2f3   : > { %v1517_v14 = vmul.f32 -1.442695, %v1303_v12  ;;  %v1518_v15 = vmul.f32 -1.442695, %v1304_v13 }
 0x2f5   : > { %1633 = vpow2.f32 %v1517_v14 }
 0x2f6   : > { %1635 = vpow2.f32 %v1518_v15 }
 0x2ff   : > { %v1634_v16 = vpop.eup %1633 }
 0x300   : > { %v1636_v17 = vpop.eup %1635  ;;  %v1311_v18 = vadd.f32 1.0, %v1634_v16 }
 0x301   : > { %v1312_v19 = vadd.f32 1.0, %v1636_v17 }
 0x302   : > { %1637 = vrcp.f32 %v1311_v18 }
 0x303   : > { %1639 = vrcp.f32 %v1312_v19 }
 0x30c   : > { %v1638_v20 = vpop.eup %1637 }
 0x30d   : > { %v1640_v21 = vpop.eup %1639  ;;  %v1317_v7 = vmul.f32 %v1638_v20, %v1303_v12 }
 0x30e   : > { %v1318_v22 = vmul.f32 %v1640_v21, %v1304_v13 }
 0x310   : > { %v1321_v23 = vcombine.low %v1317_v7, %v1318_v22 }
 0x312   : > { %1323 = vst [vmem:[%s292_s9] sm:$0xff] %v1321_v23 }
 0x313   : > { %1654 = shalt.err (!%p1651_p7)
}
 0x314   : > { %s1655_s16 = scalar_lea.hbm %s1995_s14, 128  ;;  %s1659_s8 = scalar_lea.hbm %s2053_s5, 512 }
 0x315   : > { %p1656_p9 = scmp.ne.s32.totalorder %s1995_s14, %s1655_s16  ;;  %p1660_p12 = scmp.lt.u32.totalorder %s1995_s14, %s2053_s5 }
 0x316   : > { %p1661_p13 = scmp.lt.u32.totalorder %s1659_s8, %s1655_s16  ;;  %p1663_p1 = scmp.lt.u32.totalorder %s1655_s16, %s1995_s14 }
 0x317   : > { %p1657_p10 = pnand %p1656_p9, %p1829_p3 }
 0x318   : > { %p1662_p0 = por %p1661_p13, %p1660_p12 }
 0x319   : > { %p1658_p11 = pneg %p1657_p10 }
 0x31a   : > { %p1664_p2 = por %p1663_p1, %p1662_p0 }
 0x31c   : > { %p1665_p4 = pnand %p1664_p2, %p1658_p11 }
 0x31e   : > { %1668 = shalt.err (!%p1665_p4)
}
 0x31f   : > { %1547 = dma.vmem_to_hbm [thread:$0]  (%p1829_p3), %s1997_s12, 128, %s1995_s14, %s1325_s21  }
 0x320 PF: > { %p1553_p5 = scmp.ge.s32.totalorder %s1735_s25, 2  ;;  %s1353_s13 = sand.u32 1, %s1707_s18  }
 0x321   : > { %s1354_s22 = scalar_lea.sflag [#allocation3], %s1353_s13 }
 0x322   : > { %p1550_p6 = pnand %p1553_p5, %p1838_p8 }
 0x324   : > { %1702 = dma.done.wait (!%p1550_p6), %s1354_s22, 128  }
 0x325   : > { %1704 = vsyncadd (!%p1550_p6), %s1354_s22, 4294967168  ;;  %s18_s25 = sadd.s32 1, %s1735_s25   ;;  %s2056_s18 = smov %s1711_s19 }
 0x326   : > { %p15_p7 = scmp.ge.s32.totalorder %s18_s25, 6   ;;  %s2057_s19 = smov %s1715_s20 }
 0x327   : > { %s2058_s20 = smov %s1847_s11  ;;  %s2059_s21 = smov %s1727_s23 }
 0x328   : > { %s2060_s22 = smov %s1731_s24  ;;  %s2061_s23 = smov %s2064_s28 }
 0x329   : > { %s2062_s24 = smov %s2068_s29  ;;  %17 = sbr.rel (!%p15_p7) target bundleno = 5 (0x5), region = 99 }
 0x330   :  { %1359 = vsyncpa [#allocation3], 1 }
 0x331   :  { %1361 = vsyncpa [#allocation3 + $0x1], 1 }

</bundles_post_ra>
